<compile_context>
chip_gen: v7x
topology: tpu7x:2x2x1
jax: 0.10.0
libtpu: 0.0.40
codegen_flags: <defaults>
</compile_context>

<pallas_src>
import functools

import jax
import jax.numpy as jnp
from jax import lax
from jax.experimental import pallas as pl
from jax.experimental.pallas import tpu as pltpu


def _sep_conv_bn_act_kernel(x_ref, wdw_ref, wpw_ref, bias_ref, out_ref, halo_ref,
                            *, W, KH, KW, TH, G, Cin, Cout):
    """One (image-group, row-band) grid step.

    x_ref:    (G*Cin, H*W)          full packed image group (channels/images on
                                    sublanes, flattened pixels on lanes)
    wdw_ref:  (G*Cin, KH*KW)        depthwise weights, tiled per packed image
    wpw_ref:  (Cout, Cin)           pointwise weights with BN(eval) scale folded in
    bias_ref: (Cout, 1)             folded BN bias
    out_ref:  (G*Cout, TL)          lane-dense output band
    halo_ref: (G*Cin, L) f32        scratch: this band's rows + halo rows + column guards
    """
    band = pl.program_id(1)
    n_bands = pl.num_programs(1)

    GC = G * Cin
    TL = TH * W
    ph, pw = (KH - 1) // 2, (KW - 1) // 2      # 'same' padding, stride=1, dilation=1
    PH = ph * W                                 # halo rows worth of lanes
    MID = pw + PH                               # offset of band's first pixel in halo buf
    L = TL + 2 * PH + 2 * pw                    # halo buffer length

    start = pl.multiple_of(band * TL, TL)       # bands are whole rows -> multiple of W

    # ---- stage band + halo rows into the f32 halo scratch --------------------
    # Layout: [left guard pw | top halo PH | band TL | bottom halo PH | right guard pw]
    # Out-of-image halo rows are zero (implements zero padding); guard columns are
    # only ever read at column-masked tap positions, but we zero them anyway.
    if pw > 0:
        halo_ref[:, :pw] = jnp.zeros((GC, pw), jnp.float32)
        halo_ref[:, L - pw:] = jnp.zeros((GC, pw), jnp.float32)
    if ph > 0:
        @pl.when(band == 0)
        def _():
            halo_ref[:, pw:pw + PH] = jnp.zeros((GC, PH), jnp.float32)

        @pl.when(band > 0)
        def _():
            # read the (128-aligned) previous band and keep its last PH lanes
            prev = x_ref[:, pl.ds(start - TL, TL)].astype(jnp.float32)
            halo_ref[:, pw:pw + PH] = prev[:, TL - PH:]

        @pl.when(band == n_bands - 1)
        def _():
            halo_ref[:, MID + TL:MID + TL + PH] = jnp.zeros((GC, PH), jnp.float32)

        @pl.when(band < n_bands - 1)
        def _():
            nxt = x_ref[:, pl.ds(start + TL, TL)].astype(jnp.float32)
            halo_ref[:, MID + TL:MID + TL + PH] = nxt[:, :PH]

    halo_ref[:, MID:MID + TL] = x_ref[:, pl.ds(start, TL)].astype(jnp.float32)

    # ---- depthwise KHxKW conv on this band ------------------------------------
    # Column-validity masks hoisted out of the tap loop (rows are handled entirely
    # by the zero halo rows above, so no row masks / div / mod per tap).
    col = lax.broadcasted_iota(jnp.int32, (GC, TL), 1) % W
    col_mask = {dw: (col >= -dw) if dw < 0 else (col < W - dw)
                for dw in range(-pw, pw + 1) if dw != 0}

    acc = jnp.zeros((GC, TL), jnp.float32)
    for kh in range(KH):
        for kw in range(KW):
            dh, dw = kh - ph, kw - pw
            off = MID + dh * W + dw                       # static, in [0, L - TL]
            vals = halo_ref[:, off:off + TL]              # (GC, TL) f32
            if dw != 0:
                vals = jnp.where(col_mask[dw], vals, 0.0)
            tap = kh * KW + kw
            acc = acc + vals * wdw_ref[:, tap:tap + 1].astype(jnp.float32)

    # ---- pointwise 1x1 conv + folded BN bias + ReLU ----------------------------
    b = bias_ref[...].astype(jnp.float32)                 # (Cout, 1)
    wpw = wpw_ref[...].astype(jnp.float32)                # (Cout, Cin)
    if G == 1 and Cin >= 64 and Cout >= 64:
        # Production channel counts: MXU matmul (tile channels to 128 on v5e / 256
        # on v6e-v7x in the wrapper for full systolic-array utilization).
        y = jnp.dot(wpw, acc, preferred_element_type=jnp.float32)
        y = jnp.maximum(y + b, 0.0)
    else:
        # Tiny channel counts: Cin-unrolled VPU outer product, per packed image.
        parts = []
        for g in range(G):
            yg = jnp.zeros((Cout, TL), jnp.float32)
            for c in range(Cin):
                yg = yg + wpw[:, c:c + 1] * acc[g * Cin + c:g * Cin + c + 1, :]
            parts.append(jnp.maximum(yg + b, 0.0))
        y = parts[0] if G == 1 else jnp.concatenate(parts, axis=0)
    out_ref[...] = y.astype(out_ref.dtype)


def separable_conv_bn_act(x_nchw, w_dw, w_pw, gamma, beta, running_mean,
                          running_var, eps=1e-5, *, max_band_lanes=2048):
    """x_nchw: (N, Cin, H, W); w_dw: (KH, KW, Cin); w_pw: (Cin, Cout). NCHW out.

    Input/output may be float32 or bfloat16 (compute is always f32 in-kernel).
    """
    N, Cin, H, W = x_nchw.shape
    KH, KW, _ = w_dw.shape
    Cout = w_pw.shape[1]
    HW = H * W
    ph = (KH - 1) // 2
    pw = (KW - 1) // 2
    itemsize = jnp.dtype(x_nchw.dtype).itemsize

    # --- sublane packing: G images per grid step so G*Cin fills the 8 f32 sublanes.
    G = 1
    for g in range(min(N, max(1, 8 // max(Cin, 1))), 0, -1):
        if N % g == 0:
            G = g
            break
    NG = N // G
    GC = G * Cin

    # --- whole-row band tiling: biggest band (<= max_band_lanes lanes) that keeps
    #     output stores lane-dense; whole image if it is small enough.
    TH = H
    if HW > max_band_lanes:
        for t in range(H, 0, -1):
            if H % t == 0 and t * W <= max_band_lanes and (t * W) % 128 == 0 and t >= ph:
                TH = t
                break
    TL = TH * W
    n_bands = H // TH
    L = TL + 2 * ph * W + 2 * pw

    # --- weight-side prep (tiny): fold BN(eval) scale into the pointwise weight.
    scale = (gamma.astype(jnp.float32) /
             jnp.sqrt(running_var.astype(jnp.float32) + eps))               # (Cout,)
    wpw_folded = (w_pw.astype(jnp.float32) * scale[None, :]).T              # (Cout, Cin)
    bias = (beta.astype(jnp.float32) -
            running_mean.astype(jnp.float32) * scale).reshape(Cout, 1)      # (Cout, 1)
    wdw_taps = jnp.transpose(w_dw, (2, 0, 1)).reshape(Cin, KH * KW)
    wdw_packed = jnp.tile(wdw_taps, (G, 1)).astype(jnp.float32)             # (GC, KH*KW)

    # Free-ish layout plumbing: flatten spatial onto the lane axis and pack G
    # images onto the sublane axis.
    x_flat = x_nchw.reshape(NG, GC, HW)

    kernel = functools.partial(_sep_conv_bn_act_kernel,
                               W=W, KH=KH, KW=KW, TH=TH, G=G, Cin=Cin, Cout=Cout)

    # Explicit VMEM budget: double-buffered input/output blocks + halo scratch,
    # with headroom; capped well under v7x's 64 MiB physical VMEM.
    vmem_est = (2 * GC * HW * itemsize
                + 2 * G * Cout * TL * itemsize
                + GC * L * 4
                + (GC * KH * KW + Cout * Cin + Cout) * 4 * 2)
    vmem_limit = int(min(max(4 * vmem_est, 16 * 1024 * 1024), 48 * 1024 * 1024))

    flops = int(2 * N * HW * (Cin * KH * KW + Cin * Cout + Cout))
    bytes_accessed = int(N * Cin * HW * itemsize          # input
                         + N * Cout * HW * itemsize       # output
                         + (GC * KH * KW + Cout * Cin + Cout) * 4)

    out_flat = pl.pallas_call(
        kernel,
        out_shape=jax.ShapeDtypeStruct((NG, G * Cout, HW), x_nchw.dtype),
        grid=(NG, n_bands),
        in_specs=[
            # full packed image group per n; block index ignores the band axis
            # -> one DMA per image group, reused across its bands.
            pl.BlockSpec((None, GC, HW), lambda n, b: (n, 0, 0)),
            pl.BlockSpec((GC, KH * KW), lambda n, b: (0, 0)),
            pl.BlockSpec((Cout, Cin), lambda n, b: (0, 0)),
            pl.BlockSpec((Cout, 1), lambda n, b: (0, 0)),
        ],
        out_specs=pl.BlockSpec((None, G * Cout, TL), lambda n, b: (n, 0, b)),
        scratch_shapes=[pltpu.VMEM((GC, L), jnp.float32)],
        compiler_params=pltpu.CompilerParams(
            # No cross-band dependency anymore -> both axes independent; lets v7x
            # split either axis across its two TensorCores.
            dimension_semantics=("parallel", "parallel"),
            vmem_limit_bytes=vmem_limit),
        cost_estimate=pl.CostEstimate(flops=flops, transcendentals=0,
                                      bytes_accessed=bytes_accessed),
    )(x_flat, wdw_packed, wpw_folded, bias)

    return out_flat.reshape(N, Cout, H, W)


def reference(x_nchw, w_dw, w_pw, gamma, beta, running_mean, running_var, eps=1e-5):
    """Pure-JAX reference of the same forward pass (NCHW in/out, f32)."""
    x = jnp.transpose(x_nchw, (0, 2, 3, 1)).astype(jnp.float32)
    N, H, W, C = x.shape
    KH, KW, _ = w_dw.shape
    ph, pw = (KH - 1) // 2, (KW - 1) // 2
    xp = jnp.pad(x, ((0, 0), (ph, ph), (pw, pw), (0, 0)))
    acc = jnp.zeros((N, H, W, C), jnp.float32)
    for kh in range(KH):
        for kw in range(KW):
            acc = acc + xp[:, kh:kh + H, kw:kw + W, :] * w_dw[kh, kw, :]
    y = jnp.einsum('nhwc,cd->nhwd', acc, w_pw)
    scale = gamma / jnp.sqrt(running_var + eps)
    bias = beta - running_mean * scale
    y = jnp.maximum(y * scale + bias, 0.0)
    return jnp.transpose(y, (0, 3, 1, 2))


if __name__ == "__main__":
    # Small deterministic config: in_channels=4, out_channels=8, 3x3 depthwise,
    # 1x1 pointwise, channel_multiplier=1.0, stride=1, BatchNorm2d(eval) + ReLU.
    N, Cin, H, W = 2, 4, 16, 16
    Cout = 8
    KH = KW = 3

    key = jax.random.PRNGKey(0)
    k_x, k_dw, k_pw, k_g, k_b, k_m, k_v = jax.random.split(key, 7)

    x = jax.random.normal(k_x, (N, Cin, H, W), dtype=jnp.float32)
    # Depthwise weight: PyTorch shape (Cin, 1, KH, KW) -> stored as (KH, KW, Cin).
    w_dw = jax.random.normal(k_dw, (KH, KW, Cin), dtype=jnp.float32) * 0.2
    # Pointwise weight: PyTorch shape (Cout, Cin, 1, 1) -> stored as (Cin, Cout).
    w_pw = jax.random.normal(k_pw, (Cin, Cout), dtype=jnp.float32) * 0.2
    # BatchNorm2d params / running stats (eval-mode semantics).
    gamma = 1.0 + 0.1 * jax.random.normal(k_g, (Cout,), dtype=jnp.float32)
    beta = 0.1 * jax.random.normal(k_b, (Cout,), dtype=jnp.float32)
    running_mean = 0.05 * jax.random.normal(k_m, (Cout,), dtype=jnp.float32)
    running_var = 1.0 + 0.1 * jax.nn.softplus(
        jax.random.normal(k_v, (Cout,), dtype=jnp.float32))

    ref = reference(x, w_dw, w_pw, gamma, beta, running_mean, running_var)

    # 1) Main path: whole image per step (single band), 2 images packed per step.
    out = separable_conv_bn_act(x, w_dw, w_pw, gamma, beta, running_mean, running_var)
    out = jax.block_until_ready(out)
    assert out.shape == (N, Cout, H, W)
    assert jnp.allclose(out, ref, atol=1e-4, rtol=1e-4), "mismatch vs reference (single band)"

    # 2) Multi-band path: force 128-lane row bands to exercise the halo logic.
    out_banded = separable_conv_bn_act(x, w_dw, w_pw, gamma, beta, running_mean,
                                       running_var, max_band_lanes=128)
    out_banded = jax.block_until_ready(out_banded)
    assert jnp.allclose(out_banded, ref, atol=1e-4, rtol=1e-4), "mismatch vs reference (banded)"

    # 3) bf16 HBM I/O smoke test (f32 accumulation in-kernel).
    out_bf16 = separable_conv_bn_act(x.astype(jnp.bfloat16), w_dw, w_pw, gamma, beta,
                                     running_mean, running_var)
    out_bf16 = jax.block_until_ready(out_bf16)
    assert out_bf16.shape == (N, Cout, H, W) and out_bf16.dtype == jnp.bfloat16
    assert bool(jnp.all(jnp.isfinite(out_bf16.astype(jnp.float32))))

    print("KERNEL_OK")
</pallas_src>

<mosaic_0001>
module attributes {stable_mosaic.version = 11 : i64} {
  func.func @_sep_conv_bn_act_kernel(%arg0: i32, %arg1: i32, %arg2: memref<1x8x256xf32, #tpu.memory_space<vmem>>, %arg3: memref<8x9xf32, #tpu.memory_space<vmem>>, %arg4: memref<8x4xf32, #tpu.memory_space<vmem>>, %arg5: memref<8x1xf32, #tpu.memory_space<vmem>>, %arg6: memref<1x16x256xf32, #tpu.memory_space<vmem>>, %arg7: memref<8x290xf32, #tpu.memory_space<vmem>>) attributes {dimension_semantics = [#tpu.dimension_semantics<parallel>, #tpu.dimension_semantics<parallel>], iteration_bounds = array<i64: 1, 1>, scalar_prefetch = 0 : i64, scratch_operands = 1 : i64, tpu.core_type = #tpu.core_type<tc>, window_params = [{transform_indices = @transform_0, window_bounds = array<i64: 1, 8, 256>}, {pipeline_mode = #tpu.pipeline_mode<synchronous>, transform_indices = @transform_1, window_bounds = array<i64: 8, 9>}, {pipeline_mode = #tpu.pipeline_mode<synchronous>, transform_indices = @transform_2, window_bounds = array<i64: 8, 4>}, {pipeline_mode = #tpu.pipeline_mode<synchronous>, transform_indices = @transform_3, window_bounds = array<i64: 8, 1>}, {transform_indices = @transform_4, window_bounds = array<i64: 1, 16, 256>}]} {
    %c256_i32 = arith.constant 256 : i32
    %0 = arith.muli %arg1, %c256_i32 : i32
    %1 = tpu.assume_multiple %0, 256 : i32
    %cst = arith.constant 0.000000e+00 : f32
    %2 = vector.broadcast %cst : f32 to vector<8x1xf32>
    %c0 = arith.constant 0 : index
    %c0_0 = arith.constant 0 : index
    %3 = vector.load %arg7[%c0, %c0_0] : memref<8x290xf32, #tpu.memory_space<vmem>>, vector<8x1xf32>
    tpu.vector_store %arg7[%c0, %c0_0], %2 {strides = array<i32>} : memref<8x290xf32, #tpu.memory_space<vmem>>, vector<8x1xf32>,
    %cst_1 = arith.constant 0.000000e+00 : f32
    %4 = vector.broadcast %cst_1 : f32 to vector<8x1xf32>
    %c0_2 = arith.constant 0 : index
    %c289 = arith.constant 289 : index
    %5 = vector.load %arg7[%c0_2, %c289] : memref<8x290xf32, #tpu.memory_space<vmem>>, vector<8x1xf32>
    tpu.vector_store %arg7[%c0_2, %c289], %4 {strides = array<i32>} : memref<8x290xf32, #tpu.memory_space<vmem>>, vector<8x1xf32>,
    %c0_i32 = arith.constant 0 : i32
    %6 = arith.cmpi eq, %arg1, %c0_i32 : i32
    %7 = arith.extui %6 : i1 to i32
    %c0_i32_3 = arith.constant 0 : i32
    %8 = arith.cmpi ne, %7, %c0_i32_3 : i32
    scf.if %8 {
      %cst_59 = arith.constant 0.000000e+00 : f32
      %165 = vector.broadcast %cst_59 : f32 to vector<8x16xf32>
      %c0_60 = arith.constant 0 : index
      %c1_61 = arith.constant 1 : index
      %166 = vector.load %arg7[%c0_60, %c1_61] : memref<8x290xf32, #tpu.memory_space<vmem>>, vector<8x16xf32>
      tpu.vector_store %arg7[%c0_60, %c1_61], %165 {strides = array<i32>} : memref<8x290xf32, #tpu.memory_space<vmem>>, vector<8x16xf32>,
    } else {
    }
    %c0_i32_4 = arith.constant 0 : i32
    %9 = arith.cmpi sgt, %arg1, %c0_i32_4 : i32
    %10 = arith.extui %9 : i1 to i32
    %c0_i32_5 = arith.constant 0 : i32
    %11 = arith.cmpi ne, %10, %c0_i32_5 : i32
    scf.if %11 {
      %c256_i32_59 = arith.constant 256 : i32
      %165 = arith.subi %1, %c256_i32_59 : i32
      %c0_60 = arith.constant 0 : index
      %c0_61 = arith.constant 0 : index
      %166 = arith.index_cast %165 : i32 to index
      %167 = vector.load %arg2[%c0_60, %c0_61, %166] : memref<1x8x256xf32, #tpu.memory_space<vmem>>, vector<1x8x256xf32>
      %168 = vector.shape_cast %167 : vector<1x8x256xf32> to vector<8x256xf32>
      %169 = vector.extract_strided_slice %168 {offsets = [0, 240], sizes = [8, 16], strides = [1, 1]} : vector<8x256xf32> to vector<8x16xf32>
      %c0_62 = arith.constant 0 : index
      %c1_63 = arith.constant 1 : index
      %170 = vector.load %arg7[%c0_62, %c1_63] : memref<8x290xf32, #tpu.memory_space<vmem>>, vector<8x16xf32>
      tpu.vector_store %arg7[%c0_62, %c1_63], %169 {strides = array<i32>} : memref<8x290xf32, #tpu.memory_space<vmem>>, vector<8x16xf32>,
    } else {
    }
    %c0_i32_6 = arith.constant 0 : i32
    %12 = arith.cmpi eq, %arg1, %c0_i32_6 : i32
    %13 = arith.extui %12 : i1 to i32
    %c0_i32_7 = arith.constant 0 : i32
    %14 = arith.cmpi ne, %13, %c0_i32_7 : i32
    scf.if %14 {
      %cst_59 = arith.constant 0.000000e+00 : f32
      %165 = vector.broadcast %cst_59 : f32 to vector<8x16xf32>
      %c0_60 = arith.constant 0 : index
      %c273 = arith.constant 273 : index
      %166 = vector.load %arg7[%c0_60, %c273] : memref<8x290xf32, #tpu.memory_space<vmem>>, vector<8x16xf32>
      tpu.vector_store %arg7[%c0_60, %c273], %165 {strides = array<i32>} : memref<8x290xf32, #tpu.memory_space<vmem>>, vector<8x16xf32>,
    } else {
    }
    %c0_i32_8 = arith.constant 0 : i32
    %15 = arith.cmpi slt, %arg1, %c0_i32_8 : i32
    %16 = arith.extui %15 : i1 to i32
    %c0_i32_9 = arith.constant 0 : i32
    %17 = arith.cmpi ne, %16, %c0_i32_9 : i32
    scf.if %17 {
      %c256_i32_59 = arith.constant 256 : i32
      %165 = arith.addi %1, %c256_i32_59 : i32
      %c0_60 = arith.constant 0 : index
      %c0_61 = arith.constant 0 : index
      %166 = arith.index_cast %165 : i32 to index
      %167 = vector.load %arg2[%c0_60, %c0_61, %166] : memref<1x8x256xf32, #tpu.memory_space<vmem>>, vector<1x8x256xf32>
      %168 = vector.shape_cast %167 : vector<1x8x256xf32> to vector<8x256xf32>
      %169 = vector.extract_strided_slice %168 {offsets = [0, 0], sizes = [8, 16], strides = [1, 1]} : vector<8x256xf32> to vector<8x16xf32>
      %c0_62 = arith.constant 0 : index
      %c273 = arith.constant 273 : index
      %170 = vector.load %arg7[%c0_62, %c273] : memref<8x290xf32, #tpu.memory_space<vmem>>, vector<8x16xf32>
      tpu.vector_store %arg7[%c0_62, %c273], %169 {strides = array<i32>} : memref<8x290xf32, #tpu.memory_space<vmem>>, vector<8x16xf32>,
    } else {
    }
    %c0_10 = arith.constant 0 : index
    %c0_11 = arith.constant 0 : index
    %18 = arith.index_cast %1 : i32 to index
    %19 = vector.load %arg2[%c0_10, %c0_11, %18] : memref<1x8x256xf32, #tpu.memory_space<vmem>>, vector<1x8x256xf32>
    %20 = vector.shape_cast %19 : vector<1x8x256xf32> to vector<8x256xf32>
    %c0_12 = arith.constant 0 : index
    %c17 = arith.constant 17 : index
    %21 = vector.load %arg7[%c0_12, %c17] : memref<8x290xf32, #tpu.memory_space<vmem>>, vector<8x256xf32>
    tpu.vector_store %arg7[%c0_12, %c17], %20 {strides = array<i32>} : memref<8x290xf32, #tpu.memory_space<vmem>>, vector<8x256xf32>,
    %22 = tpu.iota {dimensions = array<i32: 1>} : vector<8x256xi32>
    %c16_i32 = arith.constant 16 : i32
    %c0_i32_13 = arith.constant 0 : i32
    %23 = arith.cmpi eq, %c16_i32, %c0_i32_13 : i32
    %c1_i32 = arith.constant 1 : i32
    %24 = arith.select %23, %c1_i32, %c16_i32 : i32
    %25 = vector.broadcast %24 : i32 to vector<8x256xi32>
    %26 = arith.remsi %22, %25 : vector<8x256xi32>
    %c0_i32_14 = arith.constant 0 : i32
    %27 = vector.broadcast %c0_i32_14 : i32 to vector<8x256xi32>
    %28 = arith.cmpi ne, %26, %27 : vector<8x256xi32>
    %c0_i32_15 = arith.constant 0 : i32
    %29 = vector.broadcast %c0_i32_15 : i32 to vector<8x256xi32>
    %30 = arith.cmpi slt, %26, %29 : vector<8x256xi32>
    %c0_i32_16 = arith.constant 0 : i32
    %31 = arith.cmpi slt, %24, %c0_i32_16 : i32
    %32 = vector.broadcast %31 : i1 to vector<8x256xi1>
    %33 = vector.broadcast %32 : vector<8x256xi1> to vector<8x256xi1>
    %34 = arith.xori %30, %33 : vector<8x256xi1>
    %35 = arith.andi %34, %28 : vector<8x256xi1>
    %36 = vector.broadcast %24 : i32 to vector<8x256xi32>
    %37 = arith.addi %26, %36 : vector<8x256xi32>
    %38 = arith.select %35, %37, %26 : vector<8x256xi1>, vector<8x256xi32>
    %c1_i32_17 = arith.constant 1 : i32
    %39 = vector.broadcast %c1_i32_17 : i32 to vector<8x256xi32>
    %40 = arith.cmpi sge, %38, %39 : vector<8x256xi32>
    %c15_i32 = arith.constant 15 : i32
    %41 = vector.broadcast %c15_i32 : i32 to vector<8x256xi32>
    %42 = arith.cmpi slt, %38, %41 : vector<8x256xi32>
    %cst_18 = arith.constant 0.000000e+00 : f32
    %43 = vector.broadcast %cst_18 : f32 to vector<8x256xf32>
    %c0_19 = arith.constant 0 : index
    %c0_20 = arith.constant 0 : index
    %44 = vector.load %arg7[%c0_19, %c0_20] : memref<8x290xf32, #tpu.memory_space<vmem>>, vector<8x256xf32>
    %cst_21 = arith.constant 0.000000e+00 : f32
    %45 = vector.broadcast %cst_21 : f32 to vector<8x256xf32>
    %46 = arith.select %40, %44, %45 : vector<8x256xi1>, vector<8x256xf32>
    %c0_22 = arith.constant 0 : index
    %c0_23 = arith.constant 0 : index
    %47 = vector.load %arg3[%c0_22, %c0_23] : memref<8x9xf32, #tpu.memory_space<vmem>>, vector<8x1xf32>
    %48 = vector.broadcast %47 : vector<8x1xf32> to vector<8x256xf32>
    %49 = arith.mulf %46, %48 : vector<8x256xf32>
    %50 = arith.addf %43, %49 : vector<8x256xf32>
    %c0_24 = arith.constant 0 : index
    %c1 = arith.constant 1 : index
    %51 = vector.load %arg7[%c0_24, %c1] : memref<8x290xf32, #tpu.memory_space<vmem>>, vector<8x256xf32>
    %c0_25 = arith.constant 0 : index
    %c1_26 = arith.constant 1 : index
    %52 = vector.load %arg3[%c0_25, %c1_26] : memref<8x9xf32, #tpu.memory_space<vmem>>, vector<8x1xf32>
    %53 = vector.broadcast %52 : vector<8x1xf32> to vector<8x256xf32>
    %54 = arith.mulf %51, %53 : vector<8x256xf32>
    %55 = arith.addf %50, %54 : vector<8x256xf32>
    %c0_27 = arith.constant 0 : index
    %c2 = arith.constant 2 : index
    %56 = vector.load %arg7[%c0_27, %c2] : memref<8x290xf32, #tpu.memory_space<vmem>>, vector<8x256xf32>
    %cst_28 = arith.constant 0.000000e+00 : f32
    %57 = vector.broadcast %cst_28 : f32 to vector<8x256xf32>
    %58 = arith.select %42, %56, %57 : vector<8x256xi1>, vector<8x256xf32>
    %c0_29 = arith.constant 0 : index
    %c2_30 = arith.constant 2 : index
    %59 = vector.load %arg3[%c0_29, %c2_30] : memref<8x9xf32, #tpu.memory_space<vmem>>, vector<8x1xf32>
    %60 = vector.broadcast %59 : vector<8x1xf32> to vector<8x256xf32>
    %61 = arith.mulf %58, %60 : vector<8x256xf32>
    %62 = arith.addf %55, %61 : vector<8x256xf32>
    %c0_31 = arith.constant 0 : index
    %c16 = arith.constant 16 : index
    %63 = vector.load %arg7[%c0_31, %c16] : memref<8x290xf32, #tpu.memory_space<vmem>>, vector<8x256xf32>
    %cst_32 = arith.constant 0.000000e+00 : f32
    %64 = vector.broadcast %cst_32 : f32 to vector<8x256xf32>
    %65 = arith.select %40, %63, %64 : vector<8x256xi1>, vector<8x256xf32>
    %c0_33 = arith.constant 0 : index
    %c3 = arith.constant 3 : index
    %66 = vector.load %arg3[%c0_33, %c3] : memref<8x9xf32, #tpu.memory_space<vmem>>, vector<8x1xf32>
    %67 = vector.broadcast %66 : vector<8x1xf32> to vector<8x256xf32>
    %68 = arith.mulf %65, %67 : vector<8x256xf32>
    %69 = arith.addf %62, %68 : vector<8x256xf32>
    %c0_34 = arith.constant 0 : index
    %c17_35 = arith.constant 17 : index
    %70 = vector.load %arg7[%c0_34, %c17_35] : memref<8x290xf32, #tpu.memory_space<vmem>>, vector<8x256xf32>
    %c0_36 = arith.constant 0 : index
    %c4 = arith.constant 4 : index
    %71 = vector.load %arg3[%c0_36, %c4] : memref<8x9xf32, #tpu.memory_space<vmem>>, vector<8x1xf32>
    %72 = vector.broadcast %71 : vector<8x1xf32> to vector<8x256xf32>
    %73 = arith.mulf %70, %72 : vector<8x256xf32>
    %74 = arith.addf %69, %73 : vector<8x256xf32>
    %c0_37 = arith.constant 0 : index
    %c18 = arith.constant 18 : index
    %75 = vector.load %arg7[%c0_37, %c18] : memref<8x290xf32, #tpu.memory_space<vmem>>, vector<8x256xf32>
    %cst_38 = arith.constant 0.000000e+00 : f32
    %76 = vector.broadcast %cst_38 : f32 to vector<8x256xf32>
    %77 = arith.select %42, %75, %76 : vector<8x256xi1>, vector<8x256xf32>
    %c0_39 = arith.constant 0 : index
    %c5 = arith.constant 5 : index
    %78 = vector.load %arg3[%c0_39, %c5] : memref<8x9xf32, #tpu.memory_space<vmem>>, vector<8x1xf32>
    %79 = vector.broadcast %78 : vector<8x1xf32> to vector<8x256xf32>
    %80 = arith.mulf %77, %79 : vector<8x256xf32>
    %81 = arith.addf %74, %80 : vector<8x256xf32>
    %c0_40 = arith.constant 0 : index
    %c32 = arith.constant 32 : index
    %82 = vector.load %arg7[%c0_40, %c32] : memref<8x290xf32, #tpu.memory_space<vmem>>, vector<8x256xf32>
    %cst_41 = arith.constant 0.000000e+00 : f32
    %83 = vector.broadcast %cst_41 : f32 to vector<8x256xf32>
    %84 = arith.select %40, %82, %83 : vector<8x256xi1>, vector<8x256xf32>
    %c0_42 = arith.constant 0 : index
    %c6 = arith.constant 6 : index
    %85 = vector.load %arg3[%c0_42, %c6] : memref<8x9xf32, #tpu.memory_space<vmem>>, vector<8x1xf32>
    %86 = vector.broadcast %85 : vector<8x1xf32> to vector<8x256xf32>
    %87 = arith.mulf %84, %86 : vector<8x256xf32>
    %88 = arith.addf %81, %87 : vector<8x256xf32>
    %c0_43 = arith.constant 0 : index
    %c33 = arith.constant 33 : index
    %89 = vector.load %arg7[%c0_43, %c33] : memref<8x290xf32, #tpu.memory_space<vmem>>, vector<8x256xf32>
    %c0_44 = arith.constant 0 : index
    %c7 = arith.constant 7 : index
    %90 = vector.load %arg3[%c0_44, %c7] : memref<8x9xf32, #tpu.memory_space<vmem>>, vector<8x1xf32>
    %91 = vector.broadcast %90 : vector<8x1xf32> to vector<8x256xf32>
    %92 = arith.mulf %89, %91 : vector<8x256xf32>
    %93 = arith.addf %88, %92 : vector<8x256xf32>
    %c0_45 = arith.constant 0 : index
    %c34 = arith.constant 34 : index
    %94 = vector.load %arg7[%c0_45, %c34] : memref<8x290xf32, #tpu.memory_space<vmem>>, vector<8x256xf32>
    %cst_46 = arith.constant 0.000000e+00 : f32
    %95 = vector.broadcast %cst_46 : f32 to vector<8x256xf32>
    %96 = arith.select %42, %94, %95 : vector<8x256xi1>, vector<8x256xf32>
    %c0_47 = arith.constant 0 : index
    %c8 = arith.constant 8 : index
    %97 = vector.load %arg3[%c0_47, %c8] : memref<8x9xf32, #tpu.memory_space<vmem>>, vector<8x1xf32>
    %98 = vector.broadcast %97 : vector<8x1xf32> to vector<8x256xf32>
    %99 = arith.mulf %96, %98 : vector<8x256xf32>
    %100 = arith.addf %93, %99 : vector<8x256xf32>
    %c0_48 = arith.constant 0 : index
    %c0_49 = arith.constant 0 : index
    %101 = vector.load %arg5[%c0_48, %c0_49] : memref<8x1xf32, #tpu.memory_space<vmem>>, vector<8x1xf32>
    %c0_50 = arith.constant 0 : index
    %c0_51 = arith.constant 0 : index
    %102 = vector.load %arg4[%c0_50, %c0_51] : memref<8x4xf32, #tpu.memory_space<vmem>>, vector<8x4xf32>
    %cst_52 = arith.constant 0.000000e+00 : f32
    %103 = vector.broadcast %cst_52 : f32 to vector<8x256xf32>
    %104 = vector.extract_strided_slice %102 {offsets = [0, 0], sizes = [8, 1], strides = [1, 1]} : vector<8x4xf32> to vector<8x1xf32>
    %105 = vector.extract_strided_slice %100 {offsets = [0, 0], sizes = [1, 256], strides = [1, 1]} : vector<8x256xf32> to vector<1x256xf32>
    %106 = vector.broadcast %104 : vector<8x1xf32> to vector<8x256xf32>
    %107 = vector.broadcast %105 : vector<1x256xf32> to vector<8x256xf32>
    %108 = arith.mulf %106, %107 : vector<8x256xf32>
    %109 = arith.addf %103, %108 : vector<8x256xf32>
    %110 = vector.extract_strided_slice %102 {offsets = [0, 1], sizes = [8, 1], strides = [1, 1]} : vector<8x4xf32> to vector<8x1xf32>
    %111 = vector.extract_strided_slice %100 {offsets = [1, 0], sizes = [1, 256], strides = [1, 1]} : vector<8x256xf32> to vector<1x256xf32>
    %112 = vector.broadcast %110 : vector<8x1xf32> to vector<8x256xf32>
    %113 = vector.broadcast %111 : vector<1x256xf32> to vector<8x256xf32>
    %114 = arith.mulf %112, %113 : vector<8x256xf32>
    %115 = arith.addf %109, %114 : vector<8x256xf32>
    %116 = vector.extract_strided_slice %102 {offsets = [0, 2], sizes = [8, 1], strides = [1, 1]} : vector<8x4xf32> to vector<8x1xf32>
    %117 = vector.extract_strided_slice %100 {offsets = [2, 0], sizes = [1, 256], strides = [1, 1]} : vector<8x256xf32> to vector<1x256xf32>
    %118 = vector.broadcast %116 : vector<8x1xf32> to vector<8x256xf32>
    %119 = vector.broadcast %117 : vector<1x256xf32> to vector<8x256xf32>
    %120 = arith.mulf %118, %119 : vector<8x256xf32>
    %121 = arith.addf %115, %120 : vector<8x256xf32>
    %122 = vector.extract_strided_slice %102 {offsets = [0, 3], sizes = [8, 1], strides = [1, 1]} : vector<8x4xf32> to vector<8x1xf32>
    %123 = vector.extract_strided_slice %100 {offsets = [3, 0], sizes = [1, 256], strides = [1, 1]} : vector<8x256xf32> to vector<1x256xf32>
    %124 = vector.broadcast %122 : vector<8x1xf32> to vector<8x256xf32>
    %125 = vector.broadcast %123 : vector<1x256xf32> to vector<8x256xf32>
    %126 = arith.mulf %124, %125 : vector<8x256xf32>
    %127 = arith.addf %121, %126 : vector<8x256xf32>
    %128 = vector.broadcast %101 : vector<8x1xf32> to vector<8x256xf32>
    %129 = arith.addf %127, %128 : vector<8x256xf32>
    %cst_53 = arith.constant 0.000000e+00 : f32
    %130 = vector.broadcast %cst_53 : f32 to vector<8x256xf32>
    %131 = arith.maximumf %129, %130 : vector<8x256xf32>
    %cst_54 = arith.constant 0.000000e+00 : f32
    %132 = vector.broadcast %cst_54 : f32 to vector<8x256xf32>
    %133 = vector.extract_strided_slice %102 {offsets = [0, 0], sizes = [8, 1], strides = [1, 1]} : vector<8x4xf32> to vector<8x1xf32>
    %134 = vector.extract_strided_slice %100 {offsets = [4, 0], sizes = [1, 256], strides = [1, 1]} : vector<8x256xf32> to vector<1x256xf32>
    %135 = vector.broadcast %133 : vector<8x1xf32> to vector<8x256xf32>
    %136 = vector.broadcast %134 : vector<1x256xf32> to vector<8x256xf32>
    %137 = arith.mulf %135, %136 : vector<8x256xf32>
    %138 = arith.addf %132, %137 : vector<8x256xf32>
    %139 = vector.extract_strided_slice %102 {offsets = [0, 1], sizes = [8, 1], strides = [1, 1]} : vector<8x4xf32> to vector<8x1xf32>
    %140 = vector.extract_strided_slice %100 {offsets = [5, 0], sizes = [1, 256], strides = [1, 1]} : vector<8x256xf32> to vector<1x256xf32>
    %141 = vector.broadcast %139 : vector<8x1xf32> to vector<8x256xf32>
    %142 = vector.broadcast %140 : vector<1x256xf32> to vector<8x256xf32>
    %143 = arith.mulf %141, %142 : vector<8x256xf32>
    %144 = arith.addf %138, %143 : vector<8x256xf32>
    %145 = vector.extract_strided_slice %102 {offsets = [0, 2], sizes = [8, 1], strides = [1, 1]} : vector<8x4xf32> to vector<8x1xf32>
    %146 = vector.extract_strided_slice %100 {offsets = [6, 0], sizes = [1, 256], strides = [1, 1]} : vector<8x256xf32> to vector<1x256xf32>
    %147 = vector.broadcast %145 : vector<8x1xf32> to vector<8x256xf32>
    %148 = vector.broadcast %146 : vector<1x256xf32> to vector<8x256xf32>
    %149 = arith.mulf %147, %148 : vector<8x256xf32>
    %150 = arith.addf %144, %149 : vector<8x256xf32>
    %151 = vector.extract_strided_slice %102 {offsets = [0, 3], sizes = [8, 1], strides = [1, 1]} : vector<8x4xf32> to vector<8x1xf32>
    %152 = vector.extract_strided_slice %100 {offsets = [7, 0], sizes = [1, 256], strides = [1, 1]} : vector<8x256xf32> to vector<1x256xf32>
    %153 = vector.broadcast %151 : vector<8x1xf32> to vector<8x256xf32>
    %154 = vector.broadcast %152 : vector<1x256xf32> to vector<8x256xf32>
    %155 = arith.mulf %153, %154 : vector<8x256xf32>
    %156 = arith.addf %150, %155 : vector<8x256xf32>
    %157 = vector.broadcast %101 : vector<8x1xf32> to vector<8x256xf32>
    %158 = arith.addf %156, %157 : vector<8x256xf32>
    %cst_55 = arith.constant 0.000000e+00 : f32
    %159 = vector.broadcast %cst_55 : f32 to vector<8x256xf32>
    %160 = arith.maximumf %158, %159 : vector<8x256xf32>
    %161 = tpu.concatenate %131, %160 in 0 : vector<8x256xf32>, vector<8x256xf32> -> vector<16x256xf32>
    %c0_56 = arith.constant 0 : index
    %c0_57 = arith.constant 0 : index
    %c0_58 = arith.constant 0 : index
    %162 = vector.load %arg6[%c0_56, %c0_57, %c0_58] : memref<1x16x256xf32, #tpu.memory_space<vmem>>, vector<1x16x256xf32>
    %163 = vector.shape_cast %162 : vector<1x16x256xf32> to vector<16x256xf32>
    %164 = vector.shape_cast %161 : vector<16x256xf32> to vector<1x16x256xf32>
    tpu.vector_store %arg6[%c0_56, %c0_57, %c0_58], %164 {strides = array<i32>} : memref<1x16x256xf32, #tpu.memory_space<vmem>>, vector<1x16x256xf32>,
    return
  }
  func.func @transform_0(%arg0: i32, %arg1: i32) -> (i32, i32, i32) {
    %c0_i32 = arith.constant 0 : i32
    %c0_i32_0 = arith.constant 0 : i32
    %c0_i32_1 = arith.constant 0 : i32
    return %arg0, %c0_i32, %c0_i32_0 : i32, i32, i32
  }
  func.func @transform_1(%arg0: i32, %arg1: i32) -> (i32, i32) {
    %c0_i32 = arith.constant 0 : i32
    %c0_i32_0 = arith.constant 0 : i32
    %c0_i32_1 = arith.constant 0 : i32
    return %c0_i32, %c0_i32_0 : i32, i32
  }
  func.func @transform_2(%arg0: i32, %arg1: i32) -> (i32, i32) {
    %c0_i32 = arith.constant 0 : i32
    %c0_i32_0 = arith.constant 0 : i32
    %c0_i32_1 = arith.constant 0 : i32
    return %c0_i32, %c0_i32_0 : i32, i32
  }
  func.func @transform_3(%arg0: i32, %arg1: i32) -> (i32, i32) {
    %c0_i32 = arith.constant 0 : i32
    %c0_i32_0 = arith.constant 0 : i32
    %c0_i32_1 = arith.constant 0 : i32
    return %c0_i32, %c0_i32_0 : i32, i32
  }
  func.func @transform_4(%arg0: i32, %arg1: i32) -> (i32, i32, i32) {
    %c0_i32 = arith.constant 0 : i32
    %c0_i32_0 = arith.constant 0 : i32
    return %arg0, %c0_i32, %arg1 : i32, i32, i32
  }
}

</mosaic_0001>

<bundles_post_ra>
// kernel: tpu_custom_call.1
= control target key start
LH: loop header
LB: loop body
LE: loop exit
PB: predicated region body
PF: predicated region fallthrough
CT: control target
= control target key end

     0   :  { %v528_v2 = vmov 1   ;;  %s529_s19 = smov 17   ;;  %v530_v4 = vmov 7   ;;  %vm19_vm0 = vcmask 7168   ;;  %vm27_vm1 = vcmask 138248   ;;  %s729_s0 = inlined_call_operand.vmem [shape: f32[1,8,256], index: 0, kind: input, shape index: {}]   ;;  %s730_s1 = inlined_call_operand.vmem [shape: f32[8,9], index: 1, kind: input, shape index: {}]   ;;  %s731_s2 = inlined_call_operand.vmem [shape: f32[8,4], index: 2, kind: input, shape index: {}]   ;;  %s732_s3 = inlined_call_operand.vmem [shape: f32[8,1], index: 3, kind: input, shape index: {}]   ;;  %s733_s4 = inlined_call_operand.hbm [shape: f32[1,16,256], index: 4, kind: output, shape index: {}]  }
   0x1   :  { %v70_v0 = vld [vmem:[%s729_s0] sm:$0xff]  ;;  %490 = vset.pattern.permute.xlu1 %v528_v2  ;;  %v71_v3 = vld [vmem:[%s729_s0 + $0x8] sm:$0xff]  ;;  %492 = vset.pattern.permute.xlu0 %v530_v4  ;;  %v531_v5 = vmov 0.0   ;;  %vm21_vm2 = vcmask 277768   ;;  %vm48_vm3 = vcmask 269448  }
   0x2   :  { %v122_v1 = vld [vmem:[%s730_s1] sm:$0xff]  ;;  %74 = vrot.lane.b32.xlu0 %v70_v0, %s529_s19  ;;  %20 = vst.msk [vmem:[#allocation2] sm:$0xff] %vm19_vm0, %v531_v5 }
   0x3   :  { %136 = vperm.xlu1 %490, %v122_v1  }
   0x4   :  { %9 = vsyncpa [#allocation4], 0  ;;  %28 = vst.msk [vmem:[#allocation2] sm:$0xff] %vm27_vm1, %v531_v5  ;;  %v532_v6 = vmov 4   ;;  %v533_v7 = vmov 0   ;;  %v534_v8 = vmov 3   ;;  %v87_v48 = vlaneseq }
   0x5   :  { %22 = vst.msk [vmem:[#allocation2 + $0x10] sm:$0xff] %vm21_vm2, %v531_v5  ;;  %v535_v9 = vmov 2   ;;  %v536_v10 = vmov 5   ;;  %v537_v11 = vmov 6   ;;  %v538_v12 = vmov 8   ;;  %v589_v13 = vld [vmem:[%s731_s2] sm:$0xff] }
   0x6   :  { %76 = vrot.lane.b32.xlu0 %v71_v3, %s529_s19  ;;  %49 = vst.msk [vmem:[#allocation2 + $0x10] sm:$0xff] %vm48_vm3, %v531_v5  ;;  %vm83_vm4 = vcmask 1047688   ;;  %vm78_vm5 = vcmask 138240   ;;  %s539_s22 = smov 126   ;;  %s540_s2 = smov 112   ;;  %v312_v30 = vld [vmem:[%s732_s3] sm:$0xff] }
   0x7   :  { %491 = vset.pattern.permute.xlu1 %v532_v6  ;;  %s541_s23 = smov 96   ;;  %s542_s24 = smov 110   ;;  %v88_v50 = vand.u32 127, %v87_v48  ;;  %vm167_vm6 = vcmask 1031168   ;;  %vm188_vm9 = vcmask 916480   ;;  %vm151_vm10 = vcmask 1039360  }
   0x8   :  { %204 = vperm.xlu1 %491, %v122_v1   ;;  %s543_s25 = smov 94   ;;  %s544_s26 = smov 127   ;;  %vm232_vm13 = vcmask 900096   ;;  %vm253_vm14 = vcmask 785408   ;;  %vm219_vm15 = vcmask 908288   ;;  %vm297_vm0 = vcmask 769024  }
   0x9   :  { %s545_s27 = smov 111   ;;  %s546_s28 = smov 95   ;;  %v89_v53 = vadd.s32 128, %v88_v50  ;;  %v94_v54 = vand.u32 15, %v88_v50  ;;  %vm284_vm1 = vcmask 777216  }
   0xa   :  { %269 = vperm.xlu0 %492, %v122_v1   ;;  %s547_s3 = smov [#allocation3]  }
   0xb   :  { %v101_v57 = vand.u32 15, %v89_v53  ;;  %vm636_vm7 = vcmp.ge.s32.totalorder %v94_v54, 1  ;;  %vm640_vm8 = vcmp.lt.s32.totalorder %v94_v54, 15  ;;  %s449_s5 = sshll.u32 %s547_s3, 4  ;;  %s450_s5 = int_to_ptr.vmem [resolvable:$true] %s449_s5 }
   0xc   :  { %493 = vset.pattern.permute.xlu1 %v533_v7  ;;  %s504_s6 = scalar_lea.vmem %s450_s5, 512  ;;  %p509_p1 = scmp.lt.s32.totalorder %s450_s5, %s450_s5 }
   0xd   :  { %125 = vperm.xlu1 %493, %v122_v1   ;;  %vm644_vm11 = vcmp.ge.s32.totalorder %v101_v57, 1  ;;  %vm653_vm12 = vcmp.lt.s32.totalorder %v101_v57, 15  ;;  %p505_p0 = scmp.ne.s32.totalorder %s450_s5, %s504_s6  ;;  %p510_p2 = scmp.lt.s32.totalorder %s504_s6, %s504_s6 }
   0xe   :  { %495 = vset.pattern.permute.xlu0 %v534_v8 }
   0xf   :  { %196 = vperm.xlu0 %495, %v122_v1   ;;  %p511_p3 = por %p510_p2, %p509_p1 }
  0x11   :  { %494 = vset.pattern.permute.xlu1 %v535_v9  ;;  %p512_p4 = pnand %p511_p3, %p505_p0 }
  0x12   :  { %175 = vperm.xlu1 %494, %v122_v1  }
  0x13   :  { %496 = vset.pattern.permute.xlu0 %v536_v10 }
  0x14   :  { %240 = vperm.xlu0 %496, %v122_v1  }
  0x16   :  { %497 = vset.pattern.permute.xlu1 %v537_v11 }
  0x17   :  { %261 = vperm.xlu1 %497, %v122_v1  }
  0x18   :  { %498 = vset.pattern.permute.xlu0 %v538_v12 }
  0x19   :  { %305 = vperm.xlu0 %498, %v122_v1  }
  0x1b   :  { %499 = vset.pattern.permute.xlu1 %v533_v7 }
  0x1c   :  { %316 = vperm.xlu1 %499, %v589_v13  }
  0x1d   :  { %500 = vset.pattern.permute.xlu0 %v528_v2 }
  0x20   :  { %501 = vset.pattern.permute.xlu1 %v535_v9 }
  0x74   :  { %v75_v14 = vpop.permute.xlu0 %74 }
  0x75   :  { %84 = vst.msk [vmem:[#allocation2] sm:$0xff] %vm83_vm4, %v75_v14 }
  0x78   :  { %v77_v15 = vpop.permute.xlu0 %76 }
  0x79   :  { %v593_v16 = vsel %vm78_vm5, %v75_v14, %v77_v15  ;;  %86 = vst.msk [vmem:[#allocation2 + $0x10] sm:$0xff] %vm78_vm5, %v77_v15 }
  0x7a   :  { %v121_v10 = vsel %vm644_vm11, %v593_v16, 0.0 }
  0x7c   :  { %v595_v17 = vld [vmem:[#allocation2] sm:$0xff] }
  0x7d   :  { %161 = vrot.lane.b32.xlu1 %v595_v17, %s539_s22  ;;  %v120_v63 = vsel %vm636_vm7, %v595_v17, 0.0 }
  0x80   :  { %v134_v18 = vld [vmem:[#allocation2 + $0x10] sm:$0xff] }
  0x81   :  { %165 = vrot.lane.b32.xlu0 %v134_v18, %s539_s22  ;;  %182 = vrot.lane.b32.xlu1 %v595_v17, %s540_s2 }
  0x82   :  { %v137_v19 = vpop.permute.xlu1 %136 }
  0x83   :  { %v140_v20 = vmul.f32 %v137_v19, %v593_v16  ;;  %v139_v24 = vmul.f32 %v137_v19, %v595_v17  ;;  %v141_v26 = vmul.f32 %v137_v19, %v134_v18 }
  0x85   :  { %186 = vrot.lane.b32.xlu0 %v134_v18, %s540_s2  ;;  %247 = vrot.lane.b32.xlu1 %v595_v17, %s541_s23 }
  0x87   :  { %v205_v21 = vpop.permute.xlu1 %204 }
  0x88   :  { %v208_v22 = vmul.f32 %v205_v21, %v593_v16  ;;  %v207_v28 = vmul.f32 %v205_v21, %v595_v17  ;;  %v209_v29 = vmul.f32 %v205_v21, %v134_v18 }
  0x89   :  { %226 = vrot.lane.b32.xlu0 %v595_v17, %s542_s24  ;;  %291 = vrot.lane.b32.xlu1 %v595_v17, %s543_s25  ;;  %v270_v23 = vpop.permute.xlu0 %269 }
  0x8a   :  { %v272_v25 = vmul.f32 %v270_v23, %v595_v17  ;;  %v274_v27 = vmul.f32 %v270_v23, %v134_v18  ;;  %v273_v31 = vmul.f32 %v270_v23, %v593_v16 }
  0x8c   :  { %v126_v32 = vpop.permute.xlu1 %125 }
  0x8d   :  { %230 = vrot.lane.b32.xlu0 %v134_v18, %s542_s24  ;;  %295 = vrot.lane.b32.xlu1 %v134_v18, %s543_s25  ;;  %v128_v2 = vmul.f32 %v126_v32, %v120_v63 }
  0x8e   :  { %v621_v34 = vpop.permute.xlu0 %196 }
  0x91   :  { %251 = vrot.lane.b32.xlu0 %v134_v18, %s541_s23  ;;  %163 = vrot.lane.b32.xlu1 %v593_v16, %s539_s22  ;;  %v176_v33 = vpop.permute.xlu1 %175 }
  0x93   :  { %v625_v36 = vpop.permute.xlu0 %240 }
  0x95   :  { %293 = vrot.lane.b32.xlu0 %v593_v16, %s543_s25  ;;  %184 = vrot.lane.b32.xlu1 %v593_v16, %s540_s2 }
  0x96   :  { %v623_v35 = vpop.permute.xlu1 %261 }
  0x98   :  { %v629_v38 = vpop.permute.xlu0 %305 }
  0x99   :  { %147 = vrot.lane.b32.xlu0 %v140_v20, %s544_s26  ;;  %228 = vrot.lane.b32.xlu1 %v593_v16, %s542_s24 }
  0x9b   :  { %v627_v37 = vpop.permute.xlu1 %316 }
  0x9d   :  { %215 = vrot.lane.b32.xlu0 %v208_v22, %s545_s27  ;;  %249 = vrot.lane.b32.xlu1 %v593_v16, %s541_s23 }
  0xa1   :  { %278 = vrot.lane.b32.xlu0 %v272_v25, %s546_s28  ;;  %145 = vrot.lane.b32.xlu1 %v139_v24, %s544_s26 }
  0xa5   :  { %282 = vrot.lane.b32.xlu0 %v274_v27, %s546_s28  ;;  %149 = vrot.lane.b32.xlu1 %v141_v26, %s544_s26 }
  0xa9   :  { %213 = vrot.lane.b32.xlu1 %v207_v28, %s545_s27  ;;  %332 = vperm.xlu0 %500, %v589_v13  }
  0xad   :  { %217 = vrot.lane.b32.xlu1 %v209_v29, %s545_s27  ;;  %503 = vset.pattern.permute.xlu0 %v533_v7 }
  0xae   :  { %381 = vperm.xlu0 %503, %v312_v30  }
  0xb1   :  { %280 = vrot.lane.b32.xlu1 %v273_v31, %s546_s28 }
  0xb5   :  { %348 = vperm.xlu1 %501, %v589_v13  }
  0xb9   :  { %502 = vset.pattern.permute.xlu1 %v534_v8 }
  0xba   :  { %364 = vperm.xlu1 %502, %v589_v13   ;;  %v129_v13 = vmul.f32 %v126_v32, %v121_v10 }
  0xef   :  { %v162_v39 = vpop.permute.xlu1 %161 }
  0xf3   :  { %v166_v40 = vpop.permute.xlu0 %165  ;;  %v183_v41 = vpop.permute.xlu1 %182 }
  0xf7   :  { %v187_v42 = vpop.permute.xlu0 %186  ;;  %v248_v43 = vpop.permute.xlu1 %247 }
  0xfb   :  { %v227_v44 = vpop.permute.xlu0 %226  ;;  %v631_v45 = vpop.permute.xlu1 %291 }
  0xff   :  { %v633_v46 = vpop.permute.xlu1 %295  ;;  %v231_v47 = vpop.permute.xlu0 %230 }
 0x103   :  { %v164_v49 = vpop.permute.xlu1 %163  ;;  %v252_v51 = vpop.permute.xlu0 %251 }
 0x104   :  { %v168_v60 = vsel %vm167_vm6, %v162_v39, %v164_v49  ;;  %v169_v4 = vsel %vm167_vm6, %v164_v49, %v166_v40 }
 0x105   :  { %v172_v0 = vsel %vm640_vm8, %v168_v60, 0.0  ;;  %v173_v11 = vsel %vm653_vm12, %v169_v4, 0.0 }
 0x106   :  { %v178_v8 = vmul.f32 %v176_v33, %v172_v0  ;;  %v179_v21 = vmul.f32 %v176_v33, %v173_v11 }
 0x107   :  { %v185_v52 = vpop.permute.xlu1 %184  ;;  %v294_v56 = vpop.permute.xlu0 %293 }
 0x108   :  { %v189_v5 = vsel %vm188_vm9, %v183_v41, %v185_v52  ;;  %v190_v14 = vsel %vm188_vm9, %v185_v52, %v187_v42  ;;  %v299_v52 = vsel %vm297_vm0, %v294_v56, %v633_v46 }
 0x109   :  { %v193_v12 = vsel %vm636_vm7, %v189_v5, 0.0  ;;  %v194_v23 = vsel %vm644_vm11, %v190_v14, 0.0 }
 0x10a   :  { %v199_v16 = vmul.f32 %v621_v34, %v193_v12  ;;  %v200_v31 = vmul.f32 %v621_v34, %v194_v23  ;;  %v687_v34 = vshrl.u32 %v87_v48, 7 }
 0x10b   :  { %v229_v55 = vpop.permute.xlu1 %228  ;;  %v148_v1 = vpop.permute.xlu0 %147 }
 0x10c   :  { %v233_v15 = vsel %vm232_vm13, %v227_v44, %v229_v55  ;;  %v234_v25 = vsel %vm232_vm13, %v229_v55, %v231_v47  ;;  %v321_v46 = vsub.s32 0, %v687_v34 }
 0x10d   :  { %v237_v24 = vsel %vm640_vm8, %v233_v15, 0.0  ;;  %v238_v40 = vsel %vm653_vm12, %v234_v25, 0.0 }
 0x10e   :  { %v243_v32 = vmul.f32 %v625_v36, %v237_v24  ;;  %v244_v53 = vmul.f32 %v625_v36, %v238_v40  ;;  %v337_v36 = vsub.s32 1, %v687_v34  ;;  %v426_v40 = vsub.s32 7, %v687_v34 }
 0x10f   :  { %v250_v61 = vpop.permute.xlu1 %249  ;;  %v216_v19 = vpop.permute.xlu0 %215 }
 0x110   :  { %v254_v26 = vsel %vm253_vm14, %v248_v43, %v250_v61  ;;  %v255_v33 = vsel %vm253_vm14, %v250_v61, %v252_v51  ;;  %v298_v43 = vsel %vm297_vm0, %v631_v45, %v294_v56  ;;  %v303_v61 = vsel %vm653_vm12, %v299_v52, 0.0 }
 0x111   :  { %v258_v41 = vsel %vm636_vm7, %v254_v26, 0.0  ;;  %v259_v50 = vsel %vm644_vm11, %v255_v33, 0.0  ;;  %v302_v55 = vsel %vm640_vm8, %v298_v43, 0.0  ;;  %v309_v3 = vmul.f32 %v629_v38, %v303_v61 }
 0x112   :  { %v264_v54 = vmul.f32 %v623_v35, %v258_v41  ;;  %v265_v48 = vmul.f32 %v623_v35, %v259_v50  ;;  %v308_v56 = vmul.f32 %v629_v38, %v302_v55  ;;  %v353_v26 = vsub.s32 2, %v687_v34 }
 0x113   :  { %v146_v6 = vpop.permute.xlu1 %145  ;;  %v279_v42 = vpop.permute.xlu0 %278 }
 0x114   :  { %v152_v7 = vsel %vm151_vm10, %v146_v6, %v148_v1 }
 0x115   :  { %v156_v9 = vadd.f32 %v152_v7, %v128_v2  ;;  %v402_v2 = vsub.s32 5, %v687_v34 }
 0x117   :  { %v180_v17 = vadd.f32 %v178_v8, %v156_v9  ;;  %v150_v18 = vpop.permute.xlu1 %149  ;;  %v283_v62 = vpop.permute.xlu0 %282 }
 0x118   :  { %v153_v20 = vsel %vm151_vm10, %v148_v1, %v150_v18  ;;  %v390_v1 = vsub.s32 4, %v687_v34 }
 0x119   :  { %v157_v22 = vadd.f32 %v153_v20, %v129_v13  ;;  %v201_v29 = vadd.f32 %v199_v16, %v180_v17 }
 0x11b   :  { %v181_v27 = vadd.f32 %v179_v21, %v157_v22  ;;  %v214_v28 = vpop.permute.xlu1 %213 }
 0x11c   :  { %v220_v30 = vsel %vm219_vm15, %v214_v28, %v216_v19 }
 0x11d   :  { %v224_v39 = vadd.f32 %v220_v30, %v201_v29  ;;  %v202_v47 = vadd.f32 %v200_v31, %v181_v27  ;;  %v414_v27 = vsub.s32 6, %v687_v34 }
 0x11f   :  { %v245_v44 = vadd.f32 %v243_v32, %v224_v39  ;;  %v218_v49 = vpop.permute.xlu1 %217  ;;  %v369_v39 = vsub.s32 3, %v687_v34 }
 0x120   :  { %v221_v51 = vsel %vm219_vm15, %v216_v19, %v218_v49 }
 0x121   :  { %v225_v45 = vadd.f32 %v221_v51, %v202_v47  ;;  %v266_v60 = vadd.f32 %v264_v54, %v245_v44 }
 0x123   :  { %v246_v57 = vadd.f32 %v244_v53, %v225_v45  ;;  %v281_v58 = vpop.permute.xlu1 %280 }
 0x124   :  { %v285_v63 = vsel %vm284_vm1, %v279_v42, %v281_v58  ;;  %v286_v35 = vsel %vm284_vm1, %v281_v58, %v283_v62 }
 0x125   :  { %v267_v0 = vadd.f32 %v265_v48, %v246_v57  ;;  %v289_v59 = vadd.f32 %v285_v63, %v266_v60 }
 0x127   :  { %v290_v4 = vadd.f32 %v286_v35, %v267_v0  ;;  %v310_v5 = vadd.f32 %v308_v56, %v289_v59 }
 0x128   :  { %v333_v6 = vpop.permute.xlu0 %332 }
 0x129   :  { %v311_v7 = vadd.f32 %v309_v3, %v290_v4  ;;  %v322_v8 = vrot.slane %v310_v5, %v321_v46  ;;  %v338_v9 = vrot.slane %v310_v5, %v337_v36  ;;  %v391_v10 = vrot.slane %v310_v5, %v390_v1 }
 0x12a   :  { %v403_v11 = vrot.slane %v310_v5, %v402_v2  ;;  %v354_v31 = vrot.slane %v310_v5, %v353_v26  ;;  %v415_v32 = vrot.slane %v310_v5, %v414_v27  ;;  %v370_v53 = vrot.slane %v310_v5, %v369_v39 }
 0x12b   :  { %v326_v12 = vrot.slane %v311_v7, %v321_v46  ;;  %v327_v13 = vmul.f32 %v322_v8, %v627_v37  ;;  %v342_v14 = vrot.slane %v311_v7, %v337_v36  ;;  %v343_v15 = vmul.f32 %v338_v9, %v333_v6 }
 0x12c   :  { %v395_v17 = vrot.slane %v311_v7, %v390_v1  ;;  %v396_v18 = vmul.f32 %v391_v10, %v627_v37  ;;  %v407_v19 = vrot.slane %v311_v7, %v402_v2  ;;  %v408_v20 = vmul.f32 %v403_v11, %v333_v6 }
 0x12d   :  { %v328_v38 = vmul.f32 %v326_v12, %v627_v37  ;;  %v344_v21 = vmul.f32 %v342_v14, %v333_v6  ;;  %v345_v16 = vadd.f32 %v343_v15, %v327_v13  ;;  %v358_v29 = vrot.slane %v311_v7, %v353_v26  ;;  %v382_v60 = vpop.permute.xlu0 %381 }
 0x12e   :  { %v397_v22 = vmul.f32 %v395_v17, %v627_v37  ;;  %v409_v23 = vmul.f32 %v407_v19, %v333_v6  ;;  %v410_v24 = vadd.f32 %v408_v20, %v396_v18  ;;  %v419_v30 = vrot.slane %v311_v7, %v414_v27 }
 0x12f   :  { %v346_v25 = vadd.f32 %v344_v21, %v328_v38  ;;  %v374_v51 = vrot.slane %v311_v7, %v369_v39  ;;  %v431_v52 = vrot.slane %v311_v7, %v426_v40  ;;  %v427_v54 = vrot.slane %v310_v5, %v426_v40 }
 0x130   :  { %v411_v28 = vadd.f32 %v409_v23, %v397_v22 }
 0x134   :  { %v349_v33 = vpop.permute.xlu1 %348 }
 0x135   :  { %v359_v41 = vmul.f32 %v354_v31, %v349_v33  ;;  %v360_v42 = vmul.f32 %v358_v29, %v349_v33  ;;  %v420_v37 = vmul.f32 %v415_v32, %v349_v33  ;;  %v421_v43 = vmul.f32 %v419_v30, %v349_v33 }
 0x137   :  { %v361_v44 = vadd.f32 %v359_v41, %v345_v16  ;;  %v362_v47 = vadd.f32 %v360_v42, %v346_v25  ;;  %v422_v49 = vadd.f32 %v420_v37, %v410_v24  ;;  %v423_v50 = vadd.f32 %v421_v43, %v411_v28 }
 0x139   :  { %v365_v45 = vpop.permute.xlu1 %364 }
 0x13a   :  { %v375_v55 = vmul.f32 %v370_v53, %v365_v45  ;;  %v376_v48 = vmul.f32 %v374_v51, %v365_v45  ;;  %v432_v57 = vmul.f32 %v427_v54, %v365_v45  ;;  %v433_v58 = vmul.f32 %v431_v52, %v365_v45 }
 0x13c   :  { %v377_v61 = vadd.f32 %v375_v55, %v361_v44  ;;  %v378_v34 = vadd.f32 %v376_v48, %v362_v47  ;;  %v434_v62 = vadd.f32 %v432_v57, %v422_v49  ;;  %v435_v63 = vadd.f32 %v433_v58, %v423_v50 }
 0x13e   :  { %v384_v46 = vadd.f32 %v382_v60, %v377_v61  ;;  %v385_v36 = vadd.f32 %v382_v60, %v378_v34  ;;  %v436_v56 = vadd.f32 %v434_v62, %v382_v60  ;;  %v437_v0 = vadd.f32 %v435_v63, %v382_v60 }
 0x140   :  { %v386_v59 = vmax.f32 %v384_v46, 0.0  ;;  %v387_v1 = vmax.f32 %v385_v36, 0.0  ;;  %v438_v35 = vmax.f32 %v436_v56, 0.0  ;;  %v439_v2 = vmax.f32 %v437_v0, 0.0 }
 0x142   :  { %440 = vst [vmem:[#allocation3] sm:$0xff] %v386_v59  ;;  %441 = vst [vmem:[#allocation3 + $0x8] sm:$0xff] %v387_v1 }
 0x143   :  { %442 = vst [vmem:[#allocation3 + $0x10] sm:$0xff] %v438_v35  ;;  %443 = vst [vmem:[#allocation3 + $0x18] sm:$0xff] %v439_v2 }
 0x144   :  { %515 = shalt.err (!%p512_p4)
}
 0x145   :  { %s516_s9 = scalar_lea.hbm %s733_s4, 512 }
 0x146   :  { %p517_p5 = scmp.ne.s32.totalorder %s733_s4, %s516_s9  ;;  %p520_p6 = scmp.lt.u32.totalorder %s516_s9, %s733_s4 }
 0x148   :  { %p522_p7 = pnand %p520_p6, %p517_p5 }
 0x14a   :  { %525 = shalt.err (!%p522_p7)
}
 0x14b   :  { %s548_s14 = smov 256   ;;  %s549_s15 = smov 16  }
 0x14c   :  { %455 = dma.vmem_to_hbm [thread:$0]  %s450_s5, 512, %s733_s4, [#allocation4], %s548_s14, %s548_s14, %s549_s15  }
 0x14d   :  { %526 = dma.done.wait [#allocation4], 512  }
 0x14e   :  { %527 = vsyncadd [#allocation4], 4294966784 }
 0x14f   :  { %459 = vsyncpa [#allocation4], 1 }

</bundles_post_ra>
